<compile_context>
chip_gen: v7x
topology: tpu7x:2x2x1
jax: 0.10.0
libtpu: 0.0.40
codegen_flags: <defaults>
</compile_context>

<pallas_src>
import functools

import jax
import jax.numpy as jnp
from jax.experimental import pallas as pl
from jax.experimental.pallas import tpu as pltpu


def _spatial_attention_kernel(w_ref, x_ref, o_ref, sum_ref, max_ref, *, C, H, W):
    """Grid = (batch blocks, channel chunks); the channel axis is a reduction.

    w_ref   : SMEM (18,)            conv weights, layout [cin(0=avg,1=max), kh, kw]
    x_ref   : VMEM (TB, TC, H, W)   input chunk (native dtype, no halo)
    o_ref   : VMEM (TB, 1, H, W)    output block (resident across the C axis)
    sum_ref : VMEM (TB, H+2, W+2)   f32 running channel-sum with a zero halo
    max_ref : VMEM (TB, H+2, W+2)   f32 running channel-max with a zero halo
    """
    c = pl.program_id(1)
    tb = sum_ref.shape[0]

    @pl.when(c == 0)
    def _init():
        sum_ref[...] = jnp.zeros_like(sum_ref)          # halo stays 0 forever
        max_ref[...] = jnp.zeros_like(max_ref)          # halo stays 0 forever
        max_ref[:, 1:H + 1, 1:W + 1] = jnp.full((tb, H, W), -jnp.inf, jnp.float32)

    # Channel-chunk reduction (upcast to f32 only after the DMA; input may be bf16).
    x = x_ref[...].astype(jnp.float32)                  # (TB, TC, H, W)
    sum_ref[:, 1:H + 1, 1:W + 1] += jnp.sum(x, axis=1)
    max_ref[:, 1:H + 1, 1:W + 1] = jnp.maximum(max_ref[:, 1:H + 1, 1:W + 1],
                                               jnp.max(x, axis=1))

    @pl.when(c == pl.num_programs(1) - 1)
    def _finalize():
        avg = sum_ref[...] * (1.0 / C)                  # (TB, H+2, W+2), halo == 0
        mx = max_ref[...]                               # (TB, H+2, W+2), halo == 0
        acc = jnp.zeros((tb, H, W), jnp.float32)
        for dw in range(3):                             # 3 lane shifts per plane, reused over dh
            a_w = avg[:, :, dw:dw + W]
            m_w = mx[:, :, dw:dw + W]
            for dh in range(3):                         # sublane shifts are cheap
                acc = acc + w_ref[0 * 9 + dh * 3 + dw] * a_w[:, dh:dh + H, :] \
                          + w_ref[1 * 9 + dh * 3 + dw] * m_w[:, dh:dh + H, :]
        o_ref[:, 0, :, :] = jax.nn.sigmoid(acc).astype(o_ref.dtype)


def _largest_divisor_leq(n, cap):
    cap = max(1, min(n, cap))
    for d in range(cap, 0, -1):
        if n % d == 0:
            return d
    return 1


def _pick_tiles(B, C, H, W, itemsize, target_block_bytes=6 * 1024 * 1024):
    """Pick (TB, TC) so one (double-buffered) input block is a few MiB of VMEM."""
    # lane/sublane-padded footprint of one (H, W) channel plane in VMEM
    plane = pl.cdiv(H, 8) * 8 * pl.cdiv(W, 128) * 128 * itemsize
    tc = _largest_divisor_leq(C, max(1, target_block_bytes // plane))
    tb = _largest_divisor_leq(B, max(1, target_block_bytes // (plane * tc)))
    return tb, tc


def _pick_vmem_limit_bytes():
    try:
        cap = pltpu.get_tpu_info().vmem_capacity_bytes   # 64 MiB on v7x, 128 MiB on v5e/v6e
    except Exception:
        return 48 * 1024 * 1024                          # safe on every generation
    return int(min(cap * 3 // 4, 100 * 1024 * 1024))     # ~48 MiB v7x, ~96 MiB v5e/v6e


def spatial_attention(x, weight, *, tb=None, tc=None):
    """x: (B, C, H, W) NCHW (f32 or bf16); weight: (1, 2, 3, 3) = Conv2d(2,1,3,pad=1,bias=False)."""
    B, C, H, W = x.shape
    auto_tb, auto_tc = _pick_tiles(B, C, H, W, x.dtype.itemsize)
    tb = auto_tb if tb is None else tb
    tc = auto_tc if tc is None else tc
    assert B % tb == 0 and C % tc == 0, "tile sizes must divide (B, C)"

    w_flat = weight.astype(jnp.float32).reshape(18)       # [cin, kh, kw] flattened

    kern = functools.partial(_spatial_attention_kernel, C=C, H=H, W=W)
    return pl.pallas_call(
        kern,
        grid=(B // tb, C // tc),
        out_shape=jax.ShapeDtypeStruct((B, 1, H, W), x.dtype),
        in_specs=[
            pl.BlockSpec(memory_space=pltpu.MemorySpace.SMEM),           # 18 scalar weights
            pl.BlockSpec((tb, tc, H, W), lambda b, c: (b, c, 0, 0)),     # unpadded input chunk
        ],
        out_specs=pl.BlockSpec((tb, 1, H, W), lambda b, c: (b, 0, 0, 0)),
        scratch_shapes=[
            pltpu.VMEM((tb, H + 2, W + 2), jnp.float32),   # running channel sum (+ zero halo)
            pltpu.VMEM((tb, H + 2, W + 2), jnp.float32),   # running channel max (+ zero halo)
        ],
        compiler_params=pltpu.CompilerParams(
            dimension_semantics=("parallel", "arbitrary"),  # batch || on megacore; C is a reduction
            vmem_limit_bytes=_pick_vmem_limit_bytes(),
        ),
    )(w_flat, x)


if __name__ == "__main__":
    key = jax.random.PRNGKey(0)
    kx, kw = jax.random.split(key)

    B, C, H, W = 2, 4, 16, 16
    x = jax.random.normal(kx, (B, C, H, W), jnp.float32)
    # Conv2d(2, 1, 3, padding=1, bias=False) weight (PyTorch-default-like scale).
    weight = jax.random.normal(kw, (1, 2, 3, 3), jnp.float32) * (1.0 / (2 * 9) ** 0.5)

    # Plain-JAX reference (same math / op order as the PyTorch module).
    avg = jnp.mean(x, axis=1, keepdims=True)
    mx = jnp.max(x, axis=1, keepdims=True)
    catp = jnp.pad(jnp.concatenate([avg, mx], axis=1), ((0, 0), (0, 0), (1, 1), (1, 1)))
    ref = jnp.zeros((B, 1, H, W), jnp.float32)
    for dh in range(3):
        for dw in range(3):
            ref = ref + weight[0, 0, dh, dw] * catp[:, 0:1, dh:dh + H, dw:dw + W] \
                      + weight[0, 1, dh, dw] * catp[:, 1:2, dh:dh + H, dw:dw + W]
    ref = jax.nn.sigmoid(ref)

    # 1) auto-tiled path (at this tiny shape: one fused step per chip)
    out = spatial_attention(x, weight)
    jax.block_until_ready(out)
    assert out.shape == (B, 1, H, W)
    assert jnp.max(jnp.abs(out - ref)) < 1e-4, float(jnp.max(jnp.abs(out - ref)))

    # 2) forced multi-step channel reduction + per-element batch blocks
    #    (exercises the running sum/max accumulator across grid steps).
    out2 = spatial_attention(x, weight, tb=1, tc=2)
    jax.block_until_ready(out2)
    assert jnp.max(jnp.abs(out2 - ref)) < 1e-4, float(jnp.max(jnp.abs(out2 - ref)))

    print("KERNEL_OK")
</pallas_src>

<mosaic_0001>
module attributes {stable_mosaic.version = 11 : i64} {
  func.func @_spatial_attention_kernel(%arg0: i32, %arg1: i32, %arg2: memref<18xf32, #tpu.memory_space<smem>>, %arg3: memref<2x4x16x16xf32, #tpu.memory_space<vmem>>, %arg4: memref<2x1x16x16xf32, #tpu.memory_space<vmem>>, %arg5: memref<2x18x18xf32, #tpu.memory_space<vmem>>, %arg6: memref<2x18x18xf32, #tpu.memory_space<vmem>>) attributes {dimension_semantics = [#tpu.dimension_semantics<parallel>, #tpu.dimension_semantics<arbitrary>], iteration_bounds = array<i64: 1, 1>, scalar_prefetch = 0 : i64, scratch_operands = 2 : i64, tpu.core_type = #tpu.core_type<tc>, window_params = [{transform_indices = @transform_0, window_bounds = array<i64: 18>}, {transform_indices = @transform_1, window_bounds = array<i64: 2, 4, 16, 16>}, {transform_indices = @transform_2, window_bounds = array<i64: 2, 1, 16, 16>}]} {
    %c0_i32 = arith.constant 0 : i32
    %0 = arith.cmpi eq, %arg1, %c0_i32 : i32
    %1 = arith.extui %0 : i1 to i32
    %c0_i32_0 = arith.constant 0 : i32
    %2 = arith.cmpi ne, %1, %c0_i32_0 : i32
    scf.if %2 {
      %cst_18 = arith.constant 0.000000e+00 : f32
      %15 = vector.broadcast %cst_18 : f32 to vector<2x18x18xf32>
      %c0_19 = arith.constant 0 : index
      %c0_20 = arith.constant 0 : index
      %c0_21 = arith.constant 0 : index
      %16 = vector.load %arg5[%c0_19, %c0_20, %c0_21] : memref<2x18x18xf32, #tpu.memory_space<vmem>>, vector<2x18x18xf32>
      tpu.vector_store %arg5[%c0_19, %c0_20, %c0_21], %15 {strides = array<i32>} : memref<2x18x18xf32, #tpu.memory_space<vmem>>, vector<2x18x18xf32>,
      %cst_22 = arith.constant 0.000000e+00 : f32
      %17 = vector.broadcast %cst_22 : f32 to vector<2x18x18xf32>
      %c0_23 = arith.constant 0 : index
      %c0_24 = arith.constant 0 : index
      %c0_25 = arith.constant 0 : index
      %18 = vector.load %arg6[%c0_23, %c0_24, %c0_25] : memref<2x18x18xf32, #tpu.memory_space<vmem>>, vector<2x18x18xf32>
      tpu.vector_store %arg6[%c0_23, %c0_24, %c0_25], %17 {strides = array<i32>} : memref<2x18x18xf32, #tpu.memory_space<vmem>>, vector<2x18x18xf32>,
      %cst_26 = arith.constant 0xFF800000 : f32
      %19 = vector.broadcast %cst_26 : f32 to vector<2x16x16xf32>
      %c0_27 = arith.constant 0 : index
      %c1_28 = arith.constant 1 : index
      %c1_29 = arith.constant 1 : index
      %20 = vector.load %arg6[%c0_27, %c1_28, %c1_29] : memref<2x18x18xf32, #tpu.memory_space<vmem>>, vector<2x16x16xf32>
      tpu.vector_store %arg6[%c0_27, %c1_28, %c1_29], %19 {strides = array<i32>} : memref<2x18x18xf32, #tpu.memory_space<vmem>>, vector<2x16x16xf32>,
    } else {
    }
    %c0 = arith.constant 0 : index
    %c0_1 = arith.constant 0 : index
    %c0_2 = arith.constant 0 : index
    %c0_3 = arith.constant 0 : index
    %3 = vector.load %arg3[%c0, %c0_1, %c0_2, %c0_3] : memref<2x4x16x16xf32, #tpu.memory_space<vmem>>, vector<2x4x16x16xf32>
    %c0_4 = arith.constant 0 : index
    %c1 = arith.constant 1 : index
    %c1_5 = arith.constant 1 : index
    %4 = vector.load %arg5[%c0_4, %c1, %c1_5] : memref<2x18x18xf32, #tpu.memory_space<vmem>>, vector<2x16x16xf32>
    %cst = arith.constant dense<0.000000e+00> : vector<2x16x16xf32>
    %5 = vector.multi_reduction <add>, %3, %cst [1] : vector<2x4x16x16xf32> to vector<2x16x16xf32>
    %6 = arith.addf %4, %5 : vector<2x16x16xf32>
    %c0_6 = arith.constant 0 : index
    %c1_7 = arith.constant 1 : index
    %c1_8 = arith.constant 1 : index
    %7 = vector.load %arg5[%c0_6, %c1_7, %c1_8] : memref<2x18x18xf32, #tpu.memory_space<vmem>>, vector<2x16x16xf32>
    tpu.vector_store %arg5[%c0_6, %c1_7, %c1_8], %6 {strides = array<i32>} : memref<2x18x18xf32, #tpu.memory_space<vmem>>, vector<2x16x16xf32>,
    %c0_9 = arith.constant 0 : index
    %c1_10 = arith.constant 1 : index
    %c1_11 = arith.constant 1 : index
    %8 = vector.load %arg6[%c0_9, %c1_10, %c1_11] : memref<2x18x18xf32, #tpu.memory_space<vmem>>, vector<2x16x16xf32>
    %cst_12 = arith.constant dense<0xFF800000> : vector<2x16x16xf32>
    %9 = vector.multi_reduction <maximumf>, %3, %cst_12 [1] : vector<2x4x16x16xf32> to vector<2x16x16xf32>
    %10 = arith.maximumf %8, %9 : vector<2x16x16xf32>
    %c0_13 = arith.constant 0 : index
    %c1_14 = arith.constant 1 : index
    %c1_15 = arith.constant 1 : index
    %11 = vector.load %arg6[%c0_13, %c1_14, %c1_15] : memref<2x18x18xf32, #tpu.memory_space<vmem>>, vector<2x16x16xf32>
    tpu.vector_store %arg6[%c0_13, %c1_14, %c1_15], %10 {strides = array<i32>} : memref<2x18x18xf32, #tpu.memory_space<vmem>>, vector<2x16x16xf32>,
    %c0_i32_16 = arith.constant 0 : i32
    %12 = arith.cmpi eq, %arg1, %c0_i32_16 : i32
    %13 = arith.extui %12 : i1 to i32
    %c0_i32_17 = arith.constant 0 : i32
    %14 = arith.cmpi ne, %13, %c0_i32_17 : i32
    scf.if %14 {
      %c0_18 = arith.constant 0 : index
      %c0_19 = arith.constant 0 : index
      %c0_20 = arith.constant 0 : index
      %15 = vector.load %arg5[%c0_18, %c0_19, %c0_20] : memref<2x18x18xf32, #tpu.memory_space<vmem>>, vector<2x18x18xf32>
      %cst_21 = arith.constant 2.500000e-01 : f32
      %16 = vector.broadcast %cst_21 : f32 to vector<2x18x18xf32>
      %17 = arith.mulf %15, %16 : vector<2x18x18xf32>
      %c0_22 = arith.constant 0 : index
      %c0_23 = arith.constant 0 : index
      %c0_24 = arith.constant 0 : index
      %18 = vector.load %arg6[%c0_22, %c0_23, %c0_24] : memref<2x18x18xf32, #tpu.memory_space<vmem>>, vector<2x18x18xf32>
      %cst_25 = arith.constant 0.000000e+00 : f32
      %19 = vector.broadcast %cst_25 : f32 to vector<2x16x16xf32>
      %20 = vector.extract_strided_slice %17 {offsets = [0, 0, 0], sizes = [2, 18, 16], strides = [1, 1, 1]} : vector<2x18x18xf32> to vector<2x18x16xf32>
      %21 = vector.extract_strided_slice %18 {offsets = [0, 0, 0], sizes = [2, 18, 16], strides = [1, 1, 1]} : vector<2x18x18xf32> to vector<2x18x16xf32>
      %c0_26 = arith.constant 0 : index
      %22 = memref.load %arg2[%c0_26] : memref<18xf32, #tpu.memory_space<smem>>
      %23 = vector.extract_strided_slice %20 {offsets = [0, 0, 0], sizes = [2, 16, 16], strides = [1, 1, 1]} : vector<2x18x16xf32> to vector<2x16x16xf32>
      %24 = vector.broadcast %22 : f32 to vector<2x16x16xf32>
      %25 = arith.mulf %24, %23 : vector<2x16x16xf32>
      %26 = arith.addf %19, %25 : vector<2x16x16xf32>
      %c9 = arith.constant 9 : index
      %27 = memref.load %arg2[%c9] : memref<18xf32, #tpu.memory_space<smem>>
      %28 = vector.extract_strided_slice %21 {offsets = [0, 0, 0], sizes = [2, 16, 16], strides = [1, 1, 1]} : vector<2x18x16xf32> to vector<2x16x16xf32>
      %29 = vector.broadcast %27 : f32 to vector<2x16x16xf32>
      %30 = arith.mulf %29, %28 : vector<2x16x16xf32>
      %31 = arith.addf %26, %30 : vector<2x16x16xf32>
      %c3 = arith.constant 3 : index
      %32 = memref.load %arg2[%c3] : memref<18xf32, #tpu.memory_space<smem>>
      %33 = vector.extract_strided_slice %20 {offsets = [0, 1, 0], sizes = [2, 16, 16], strides = [1, 1, 1]} : vector<2x18x16xf32> to vector<2x16x16xf32>
      %34 = vector.broadcast %32 : f32 to vector<2x16x16xf32>
      %35 = arith.mulf %34, %33 : vector<2x16x16xf32>
      %36 = arith.addf %31, %35 : vector<2x16x16xf32>
      %c12 = arith.constant 12 : index
      %37 = memref.load %arg2[%c12] : memref<18xf32, #tpu.memory_space<smem>>
      %38 = vector.extract_strided_slice %21 {offsets = [0, 1, 0], sizes = [2, 16, 16], strides = [1, 1, 1]} : vector<2x18x16xf32> to vector<2x16x16xf32>
      %39 = vector.broadcast %37 : f32 to vector<2x16x16xf32>
      %40 = arith.mulf %39, %38 : vector<2x16x16xf32>
      %41 = arith.addf %36, %40 : vector<2x16x16xf32>
      %c6 = arith.constant 6 : index
      %42 = memref.load %arg2[%c6] : memref<18xf32, #tpu.memory_space<smem>>
      %43 = vector.extract_strided_slice %20 {offsets = [0, 2, 0], sizes = [2, 16, 16], strides = [1, 1, 1]} : vector<2x18x16xf32> to vector<2x16x16xf32>
      %44 = vector.broadcast %42 : f32 to vector<2x16x16xf32>
      %45 = arith.mulf %44, %43 : vector<2x16x16xf32>
      %46 = arith.addf %41, %45 : vector<2x16x16xf32>
      %c15 = arith.constant 15 : index
      %47 = memref.load %arg2[%c15] : memref<18xf32, #tpu.memory_space<smem>>
      %48 = vector.extract_strided_slice %21 {offsets = [0, 2, 0], sizes = [2, 16, 16], strides = [1, 1, 1]} : vector<2x18x16xf32> to vector<2x16x16xf32>
      %49 = vector.broadcast %47 : f32 to vector<2x16x16xf32>
      %50 = arith.mulf %49, %48 : vector<2x16x16xf32>
      %51 = arith.addf %46, %50 : vector<2x16x16xf32>
      %52 = vector.extract_strided_slice %17 {offsets = [0, 0, 1], sizes = [2, 18, 16], strides = [1, 1, 1]} : vector<2x18x18xf32> to vector<2x18x16xf32>
      %53 = vector.extract_strided_slice %18 {offsets = [0, 0, 1], sizes = [2, 18, 16], strides = [1, 1, 1]} : vector<2x18x18xf32> to vector<2x18x16xf32>
      %c1_27 = arith.constant 1 : index
      %54 = memref.load %arg2[%c1_27] : memref<18xf32, #tpu.memory_space<smem>>
      %55 = vector.extract_strided_slice %52 {offsets = [0, 0, 0], sizes = [2, 16, 16], strides = [1, 1, 1]} : vector<2x18x16xf32> to vector<2x16x16xf32>
      %56 = vector.broadcast %54 : f32 to vector<2x16x16xf32>
      %57 = arith.mulf %56, %55 : vector<2x16x16xf32>
      %58 = arith.addf %51, %57 : vector<2x16x16xf32>
      %c10 = arith.constant 10 : index
      %59 = memref.load %arg2[%c10] : memref<18xf32, #tpu.memory_space<smem>>
      %60 = vector.extract_strided_slice %53 {offsets = [0, 0, 0], sizes = [2, 16, 16], strides = [1, 1, 1]} : vector<2x18x16xf32> to vector<2x16x16xf32>
      %61 = vector.broadcast %59 : f32 to vector<2x16x16xf32>
      %62 = arith.mulf %61, %60 : vector<2x16x16xf32>
      %63 = arith.addf %58, %62 : vector<2x16x16xf32>
      %c4 = arith.constant 4 : index
      %64 = memref.load %arg2[%c4] : memref<18xf32, #tpu.memory_space<smem>>
      %65 = vector.extract_strided_slice %52 {offsets = [0, 1, 0], sizes = [2, 16, 16], strides = [1, 1, 1]} : vector<2x18x16xf32> to vector<2x16x16xf32>
      %66 = vector.broadcast %64 : f32 to vector<2x16x16xf32>
      %67 = arith.mulf %66, %65 : vector<2x16x16xf32>
      %68 = arith.addf %63, %67 : vector<2x16x16xf32>
      %c13 = arith.constant 13 : index
      %69 = memref.load %arg2[%c13] : memref<18xf32, #tpu.memory_space<smem>>
      %70 = vector.extract_strided_slice %53 {offsets = [0, 1, 0], sizes = [2, 16, 16], strides = [1, 1, 1]} : vector<2x18x16xf32> to vector<2x16x16xf32>
      %71 = vector.broadcast %69 : f32 to vector<2x16x16xf32>
      %72 = arith.mulf %71, %70 : vector<2x16x16xf32>
      %73 = arith.addf %68, %72 : vector<2x16x16xf32>
      %c7 = arith.constant 7 : index
      %74 = memref.load %arg2[%c7] : memref<18xf32, #tpu.memory_space<smem>>
      %75 = vector.extract_strided_slice %52 {offsets = [0, 2, 0], sizes = [2, 16, 16], strides = [1, 1, 1]} : vector<2x18x16xf32> to vector<2x16x16xf32>
      %76 = vector.broadcast %74 : f32 to vector<2x16x16xf32>
      %77 = arith.mulf %76, %75 : vector<2x16x16xf32>
      %78 = arith.addf %73, %77 : vector<2x16x16xf32>
      %c16 = arith.constant 16 : index
      %79 = memref.load %arg2[%c16] : memref<18xf32, #tpu.memory_space<smem>>
      %80 = vector.extract_strided_slice %53 {offsets = [0, 2, 0], sizes = [2, 16, 16], strides = [1, 1, 1]} : vector<2x18x16xf32> to vector<2x16x16xf32>
      %81 = vector.broadcast %79 : f32 to vector<2x16x16xf32>
      %82 = arith.mulf %81, %80 : vector<2x16x16xf32>
      %83 = arith.addf %78, %82 : vector<2x16x16xf32>
      %84 = vector.extract_strided_slice %17 {offsets = [0, 0, 2], sizes = [2, 18, 16], strides = [1, 1, 1]} : vector<2x18x18xf32> to vector<2x18x16xf32>
      %85 = vector.extract_strided_slice %18 {offsets = [0, 0, 2], sizes = [2, 18, 16], strides = [1, 1, 1]} : vector<2x18x18xf32> to vector<2x18x16xf32>
      %c2 = arith.constant 2 : index
      %86 = memref.load %arg2[%c2] : memref<18xf32, #tpu.memory_space<smem>>
      %87 = vector.extract_strided_slice %84 {offsets = [0, 0, 0], sizes = [2, 16, 16], strides = [1, 1, 1]} : vector<2x18x16xf32> to vector<2x16x16xf32>
      %88 = vector.broadcast %86 : f32 to vector<2x16x16xf32>
      %89 = arith.mulf %88, %87 : vector<2x16x16xf32>
      %90 = arith.addf %83, %89 : vector<2x16x16xf32>
      %c11 = arith.constant 11 : index
      %91 = memref.load %arg2[%c11] : memref<18xf32, #tpu.memory_space<smem>>
      %92 = vector.extract_strided_slice %85 {offsets = [0, 0, 0], sizes = [2, 16, 16], strides = [1, 1, 1]} : vector<2x18x16xf32> to vector<2x16x16xf32>
      %93 = vector.broadcast %91 : f32 to vector<2x16x16xf32>
      %94 = arith.mulf %93, %92 : vector<2x16x16xf32>
      %95 = arith.addf %90, %94 : vector<2x16x16xf32>
      %c5 = arith.constant 5 : index
      %96 = memref.load %arg2[%c5] : memref<18xf32, #tpu.memory_space<smem>>
      %97 = vector.extract_strided_slice %84 {offsets = [0, 1, 0], sizes = [2, 16, 16], strides = [1, 1, 1]} : vector<2x18x16xf32> to vector<2x16x16xf32>
      %98 = vector.broadcast %96 : f32 to vector<2x16x16xf32>
      %99 = arith.mulf %98, %97 : vector<2x16x16xf32>
      %100 = arith.addf %95, %99 : vector<2x16x16xf32>
      %c14 = arith.constant 14 : index
      %101 = memref.load %arg2[%c14] : memref<18xf32, #tpu.memory_space<smem>>
      %102 = vector.extract_strided_slice %85 {offsets = [0, 1, 0], sizes = [2, 16, 16], strides = [1, 1, 1]} : vector<2x18x16xf32> to vector<2x16x16xf32>
      %103 = vector.broadcast %101 : f32 to vector<2x16x16xf32>
      %104 = arith.mulf %103, %102 : vector<2x16x16xf32>
      %105 = arith.addf %100, %104 : vector<2x16x16xf32>
      %c8 = arith.constant 8 : index
      %106 = memref.load %arg2[%c8] : memref<18xf32, #tpu.memory_space<smem>>
      %107 = vector.extract_strided_slice %84 {offsets = [0, 2, 0], sizes = [2, 16, 16], strides = [1, 1, 1]} : vector<2x18x16xf32> to vector<2x16x16xf32>
      %108 = vector.broadcast %106 : f32 to vector<2x16x16xf32>
      %109 = arith.mulf %108, %107 : vector<2x16x16xf32>
      %110 = arith.addf %105, %109 : vector<2x16x16xf32>
      %c17 = arith.constant 17 : index
      %111 = memref.load %arg2[%c17] : memref<18xf32, #tpu.memory_space<smem>>
      %112 = vector.extract_strided_slice %85 {offsets = [0, 2, 0], sizes = [2, 16, 16], strides = [1, 1, 1]} : vector<2x18x16xf32> to vector<2x16x16xf32>
      %113 = vector.broadcast %111 : f32 to vector<2x16x16xf32>
      %114 = arith.mulf %113, %112 : vector<2x16x16xf32>
      %115 = arith.addf %110, %114 : vector<2x16x16xf32>
      %116 = arith.negf %115 : vector<2x16x16xf32>
      %117 = math.exp %116 : vector<2x16x16xf32>
      %cst_28 = arith.constant 1.000000e+00 : f32
      %118 = vector.broadcast %cst_28 : f32 to vector<2x16x16xf32>
      %119 = arith.addf %118, %117 : vector<2x16x16xf32>
      %120 = arith.divf %118, %119 : vector<2x16x16xf32>
      %c0_29 = arith.constant 0 : index
      %c0_30 = arith.constant 0 : index
      %c0_31 = arith.constant 0 : index
      %c0_32 = arith.constant 0 : index
      %121 = vector.load %arg4[%c0_29, %c0_30, %c0_31, %c0_32] : memref<2x1x16x16xf32, #tpu.memory_space<vmem>>, vector<2x1x16x16xf32>
      %122 = vector.shape_cast %121 : vector<2x1x16x16xf32> to vector<2x16x16xf32>
      %123 = vector.shape_cast %120 : vector<2x16x16xf32> to vector<2x1x16x16xf32>
      tpu.vector_store %arg4[%c0_29, %c0_30, %c0_31, %c0_32], %123 {strides = array<i32>} : memref<2x1x16x16xf32, #tpu.memory_space<vmem>>, vector<2x1x16x16xf32>,
    } else {
    }
    return
  }
  func.func @transform_0(%arg0: i32, %arg1: i32) -> i32 {
    %c0_i32 = arith.constant 0 : i32
    %c0_i32_0 = arith.constant 0 : i32
    return %c0_i32 : i32
  }
  func.func @transform_1(%arg0: i32, %arg1: i32) -> (i32, i32, i32, i32) {
    %c0_i32 = arith.constant 0 : i32
    %c0_i32_0 = arith.constant 0 : i32
    %c0_i32_1 = arith.constant 0 : i32
    return %arg0, %arg1, %c0_i32, %c0_i32_0 : i32, i32, i32, i32
  }
  func.func @transform_2(%arg0: i32, %arg1: i32) -> (i32, i32, i32, i32) {
    %c0_i32 = arith.constant 0 : i32
    %c0_i32_0 = arith.constant 0 : i32
    %c0_i32_1 = arith.constant 0 : i32
    %c0_i32_2 = arith.constant 0 : i32
    return %arg0, %c0_i32, %c0_i32_0, %c0_i32_1 : i32, i32, i32, i32
  }
}

</mosaic_0001>

<bundles_post_ra>
// kernel: tpu_custom_call.1
= control target key start
LH: loop header
LB: loop body
LE: loop exit
PB: predicated region body
PF: predicated region fallthrough
CT: control target
= control target key end

     0   :  { %7 = vsyncpa [#allocation7], 0  ;;  %s1529_s0 = inlined_call_operand.hbm [shape: f32[18], index: 0, kind: input, shape index: {}]   ;;  %s1530_s1 = inlined_call_operand.hbm [shape: f32[2,4,16,16], index: 1, kind: input, shape index: {}]   ;;  %s1531_s2 = inlined_call_operand.hbm [shape: f32[2,1,16,16], index: 2, kind: output, shape index: {}]  }
   0x1   :  { %8 = vsyncpa [#allocation5], 0 }
   0x2   :  { %9 = vsyncpa [#allocation6], 0  ;;  %s878_s11 = scalar_lea.hbm %s1529_s0, 16 }
   0x3   :  { %p879_p0 = scmp.ne.s32.totalorder %s1529_s0, %s878_s11  ;;  %p882_p1 = scmp.lt.u32.totalorder %s878_s11, %s1529_s0 }
   0x5   :  { %p884_p2 = pnand %p882_p1, %p879_p0 }
   0x7   :  { %887 = shalt.err (!%p884_p2)
}
   0x8   :  { %s938_s16 = smov [#allocation4]   ;;  %s939_s19 = smov [#allocation8]  }
   0x9   :  { %17 = dma.hbm_to_smem %s1529_s0, 16, %s938_s16, [#allocation7]  }
   0xa   :  { %s23_s20 = sshll.u32 %s939_s19, 4  ;;  %s888_s23 = scalar_lea.hbm %s1530_s1, 2048  ;;  %s24_s20 = int_to_ptr.vmem [resolvable:$true] %s23_s20 }
   0xb   :  { %p889_p3 = scmp.ne.s32.totalorder %s1530_s1, %s888_s23  ;;  %p892_p4 = scmp.lt.u32.totalorder %s888_s23, %s1530_s1 }
   0xd   :  { %p894_p5 = pnand %p892_p4, %p889_p3 }
   0xf   :  { %897 = shalt.err (!%p894_p5)
}
  0x10   :  { %s898_s28 = scalar_lea.vmem %s24_s20, 2048  ;;  %p903_p7 = scmp.lt.s32.totalorder %s24_s20, %s24_s20 }
  0x11   :  { %p899_p6 = scmp.ne.s32.totalorder %s24_s20, %s898_s28  ;;  %p904_p8 = scmp.lt.s32.totalorder %s898_s28, %s898_s28 }
  0x13   :  { %p905_p9 = por %p904_p8, %p903_p7 }
  0x15   :  { %p906_p10 = pnand %p905_p9, %p899_p6 }
  0x17   :  { %909 = shalt.err (!%p906_p10)
}
  0x18   :  { %s940_s0 = smov 128   ;;  %s941_s29 = smov 8  }
  0x19   :  { %29 = dma.hbm_to_vmem [thread:$0]  %s1530_s1, 2048, %s24_s20, [#allocation5], %s940_s0, %s940_s0, %s941_s29  }
  0x1a   :  { %932 = dma.done.wait [#allocation7], 16  }
  0x1b   :  { %933 = vsyncadd [#allocation7], 4294967280 }
  0x1c   :  { %934 = dma.done.wait [#allocation5], 2048  }
  0x1d   :  { %935 = vsyncadd [#allocation5], 4294965248 }
  0x1e   :  { %36 = sfence }
  0x1f   :  { %v68_v0 = vld [vmem:[#allocation8 + $0x40] sm:$0xff]  ;;  %v70_v1 = vld [vmem:[#allocation8 + $0x50] sm:$0xff]  ;;  %vm80_vm0 = vcmask 130048   ;;  %v69_v19 = vld [vmem:[#allocation8 + $0x48] sm:$0xff]  ;;  %vm41_vm1 = vcmask 146432   ;;  %s942_s1 = smov 1  }
  0x20   :  { %v72_v2 = vld [vmem:[#allocation8 + $0x60] sm:$0xff]  ;;  %v990_v3 = vld [vmem:[#allocation8 + $0x70] sm:$0xff]  ;;  %v95_v4 = vsel %vm80_vm0, %v68_v0, 0.0  ;;  %v96_v5 = vsel %vm80_vm0, %v70_v1, 0.0  ;;  %v998_v10 = vsel %vm80_vm0, %v68_v0, -inf  ;;  %v1001_v11 = vsel %vm80_vm0, %v70_v1, -inf }
  0x21   :  { %v98_v6 = vsel %vm80_vm0, %v72_v2, 0.0  ;;  %v60_v7 = vld [vmem:[#allocation8] sm:$0xff]  ;;  %v97_v8 = vadd.f32 %v96_v5, %v95_v4  ;;  %v100_v9 = vsel %vm80_vm0, %v990_v3, 0.0  ;;  %v62_v12 = vld [vmem:[#allocation8 + $0x10] sm:$0xff]  ;;  %v1004_v15 = vsel %vm80_vm0, %v72_v2, -inf  ;;  %v71_v20 = vld [vmem:[#allocation8 + $0x58] sm:$0xff] }
  0x22   :  { %v64_v13 = vld [vmem:[#allocation8 + $0x20] sm:$0xff]  ;;  %v66_v14 = vld [vmem:[#allocation8 + $0x30] sm:$0xff]  ;;  %v81_v16 = vsel %vm80_vm0, %v60_v7, 0.0  ;;  %v82_v17 = vsel %vm80_vm0, %v62_v12, 0.0  ;;  %v138_v24 = vsel %vm80_vm0, %v60_v7, -inf  ;;  %v73_v25 = vld [vmem:[#allocation8 + $0x68] sm:$0xff]  ;;  %v154_v0 = vmax.f32 %v998_v10, %v1001_v11 }
  0x23   :  { %v84_v18 = vsel %vm80_vm0, %v64_v13, 0.0  ;;  %v99_v21 = vadd.f32 %v98_v6, %v97_v8  ;;  %v83_v22 = vadd.f32 %v82_v17, %v81_v16  ;;  %v86_v23 = vsel %vm80_vm0, %v66_v14, 0.0  ;;  %v75_v26 = vld [vmem:[#allocation8 + $0x78] sm:$0xff]  ;;  %v61_v27 = vld [vmem:[#allocation8 + $0x8] sm:$0xff]  ;;  %s837_s4 = sld [smem:[#allocation4 + $0xa]]  ;;  %s1065_s5 = sld [smem:[#allocation4 + $0x1]] }
  0x24   :  { %v139_v28 = vsel %vm80_vm0, %v62_v12, -inf  ;;  %v141_v29 = vsel %vm80_vm0, %v64_v13, -inf  ;;  %v1014_v30 = vsel %vm80_vm0, %v66_v14, -inf  ;;  %v102_v31 = vsel %vm80_vm0, %v69_v19, 0.0  ;;  %v63_v32 = vld [vmem:[#allocation8 + $0x18] sm:$0xff]  ;;  %v65_v33 = vld [vmem:[#allocation8 + $0x28] sm:$0xff] }
  0x25   :  { %v101_v34 = vadd.f32 %v100_v9, %v99_v21  ;;  %v85_v35 = vadd.f32 %v84_v18, %v83_v22  ;;  %v103_v36 = vsel %vm80_vm0, %v71_v20, 0.0  ;;  %v105_v37 = vsel %vm80_vm0, %v73_v25, 0.0  ;;  %v67_v38 = vld [vmem:[#allocation8 + $0x38] sm:$0xff]  ;;  %s1067_s6 = sld [smem:[#allocation4 + $0x2]]  ;;  %s843_s7 = sld [smem:[#allocation4 + $0xb]] }
  0x26   :  { %v104_v39 = vadd.f32 %v103_v36, %v102_v31  ;;  %v107_v40 = vsel %vm80_vm0, %v75_v26, 0.0  ;;  %v88_v41 = vsel %vm80_vm0, %v61_v27, 0.0  ;;  %v89_v42 = vsel %vm80_vm0, %v63_v32, 0.0  ;;  %s1070_s8 = sld [smem:[#allocation4 + $0xd]]  ;;  %s1072_s9 = sld [smem:[#allocation4 + $0x10]] }
  0x27   :  { %117 = vrot.lane.b32.xlu1 %v101_v34, %s942_s1  ;;  %v87_v43 = vadd.f32 %v86_v23, %v85_v35  ;;  %v90_v44 = vadd.f32 %v89_v42, %v88_v41  ;;  %v91_v45 = vsel %vm80_vm0, %v65_v33, 0.0  ;;  %v93_v46 = vsel %vm80_vm0, %v67_v38, 0.0  ;;  %s1074_s10 = sld [smem:[#allocation4 + $0xe]]  ;;  %s1076_s11 = sld [smem:[#allocation4 + $0x4]] }
  0x28   :  { %v106_v47 = vadd.f32 %v105_v37, %v104_v39  ;;  %v145_v48 = vsel %vm80_vm0, %v61_v27, -inf  ;;  %v146_v49 = vsel %vm80_vm0, %v63_v32, -inf  ;;  %v148_v50 = vsel %vm80_vm0, %v65_v33, -inf  ;;  %s1082_s12 = sld [smem:[#allocation4 + $0x11]]  ;;  %s1084_s13 = sld [smem:[#allocation4 + $0x8]] }
  0x29   :  { %113 = vrot.lane.b32.xlu0 %v87_v43, %s942_s1  ;;  %v92_v51 = vadd.f32 %v91_v45, %v90_v44  ;;  %v147_v52 = vmax.f32 %v145_v48, %v146_v49  ;;  %v150_v53 = vsel %vm80_vm0, %v67_v38, -inf  ;;  %v140_v54 = vmax.f32 %v138_v24, %v139_v28  ;;  %s1088_s14 = sld [smem:[#allocation4]]  ;;  %s1090_s15 = sld [smem:[#allocation4 + $0x3]] }
  0x2a   :  { %v108_v55 = vadd.f32 %v107_v40, %v106_v47  ;;  %v159_v56 = vsel %vm80_vm0, %v69_v19, -inf  ;;  %v160_v57 = vsel %vm80_vm0, %v71_v20, -inf  ;;  %v162_v58 = vsel %vm80_vm0, %v73_v25, -inf  ;;  %s1092_s16 = sld [smem:[#allocation4 + $0x9]]  ;;  %s1094_s17 = sld [smem:[#allocation4 + $0x6]] }
  0x2b   :  { %v94_v59 = vadd.f32 %v93_v46, %v92_v51  ;;  %v149_v60 = vmax.f32 %v147_v52, %v148_v50  ;;  %v142_v61 = vmax.f32 %v140_v54, %v141_v29  ;;  %v161_v62 = vmax.f32 %v159_v56, %v160_v57  ;;  %s945_s18 = smov 127   ;;  %s1098_s19 = sld [smem:[#allocation4 + $0xc]] }
  0x2c   :  { %119 = vrot.lane.b32.xlu1 %v108_v55, %s942_s1  ;;  %v164_v63 = vsel %vm80_vm0, %v75_v26, -inf  ;;  %vm55_vm2 = vcmask 138248   ;;  %v943_v5 = vmov 0.0   ;;  %vm44_vm3 = vcmask 140288   ;;  %s1100_s20 = sld [smem:[#allocation4 + $0xf]]  ;;  %s946_s21 = smov 126  }
  0x2d   :  { %115 = vrot.lane.b32.xlu0 %v94_v59, %s942_s1  ;;  %v151_v1 = vmax.f32 %v149_v60, %v150_v53  ;;  %v144_v2 = vmax.f32 %v142_v61, %v1014_v30  ;;  %v163_v4 = vmax.f32 %v161_v62, %v162_v58  ;;  %46 = vst.msk [vmem:[#allocation2 + $0x18] sm:$0xff] %vm41_vm1, %v943_v5  ;;  %47 = vst.msk [vmem:[#allocation2 + $0x20] sm:$0xff] %vm41_vm1, %v943_v5  ;;  %v944_v8 = vmov -inf   ;;  %s840_s22 = sld [smem:[#allocation4 + $0x7]]  ;;  %s844_s23 = sld [smem:[#allocation4 + $0x5]] }
  0x2e   :  { %42 = vst.msk [vmem:[#allocation2] sm:$0xff] %vm41_vm1, %v943_v5  ;;  %43 = vst.msk [vmem:[#allocation2 + $0x8] sm:$0xff] %vm41_vm1, %v943_v5  ;;  %v157_v6 = vsel %vm80_vm0, %v990_v3, -inf  ;;  %v156_v7 = vmax.f32 %v154_v0, %v1004_v15  ;;  %v388_v34 = vstv %s837_s4  ;;  %v600_v45 = vstv %s843_s7  ;;  %s947_s24 = smov [#allocation9]  }
  0x2f   :  { %49 = vst.msk [vmem:[#allocation3] sm:$0xff] %vm41_vm1, %v943_v5  ;;  %50 = vst.msk [vmem:[#allocation3 + $0x8] sm:$0xff] %vm41_vm1, %v943_v5  ;;  %v165_v9 = vmax.f32 %v163_v4, %v164_v63  ;;  %v362_v46 = vstv %s1065_s5  ;;  %v1114_v48 = vstv %s1067_s6  ;;  %v454_v49 = vstv %s1070_s8  ;;  %s818_s25 = sshll.u32 %s947_s24, 4  ;;  %s819_s25 = int_to_ptr.vmem [resolvable:$true] %s818_s25 }
  0x30   :  { %52 = vst.msk [vmem:[#allocation3 + $0x18] sm:$0xff] %vm41_vm1, %v943_v5  ;;  %53 = vst.msk [vmem:[#allocation3 + $0x20] sm:$0xff] %vm41_vm1, %v943_v5  ;;  %172 = vrot.lane.b32.xlu1 %v151_v1, %s942_s1  ;;  %v158_v3 = vmax.f32 %v156_v7, %v157_v6  ;;  %v534_v51 = vstv %s1072_s9  ;;  %v1121_v52 = vstv %s1074_s10  ;;  %v1124_v53 = vstv %s1076_s11  ;;  %s910_s26 = scalar_lea.vmem %s819_s25, 512  ;;  %p915_p12 = scmp.lt.s32.totalorder %s819_s25, %s819_s25 }
  0x31   :  { %48 = vst.msk [vmem:[#allocation2 + $0x28] sm:$0x3] %vm44_vm3, %v943_v5  ;;  %45 = vst.msk [vmem:[#allocation2 + $0x10] sm:$0x3] %vm44_vm3, %v943_v5  ;;  %170 = vrot.lane.b32.xlu0 %v144_v2, %s942_s1  ;;  %v1129_v58 = vstv %s1082_s12  ;;  %v1132_v59 = vstv %s1084_s13  ;;  %v1137_v61 = vstv %s1088_s14  ;;  %vm245_vm4 = vcmask 1046528   ;;  %p911_p11 = scmp.ne.s32.totalorder %s819_s25, %s910_s26  ;;  %p916_p13 = scmp.lt.s32.totalorder %s910_s26, %s910_s26 }
  0x32   :  { %51 = vst.msk [vmem:[#allocation3 + $0x10] sm:$0x3] %vm44_vm3, %v943_v5  ;;  %54 = vst.msk [vmem:[#allocation3 + $0x28] sm:$0x3] %vm44_vm3, %v943_v5  ;;  %v1140_v62 = vstv %s1092_s16  ;;  %v1143_v63 = vstv %s1090_s15  ;;  %v1146_v0 = vstv %s1094_s17  ;;  %v1156_v4 = vstv %s1098_s19 }
  0x33   :  { %57 = vst.msk [vmem:[#allocation3 + $0x9] sm:$0xff] %vm55_vm2, %v944_v8  ;;  %56 = vst.msk [vmem:[#allocation3 + $0x1] sm:$0xff] %vm55_vm2, %v944_v8  ;;  %v1159_v5 = vstv %s1100_s20  ;;  %vm310_vm5 = vcmask 1045504   ;;  %p917_p0 = por %p916_p13, %p915_p12 }
  0x34   :  { %58 = vst.msk [vmem:[#allocation3 + $0x19] sm:$0xff] %vm55_vm2, %v944_v8  ;;  %59 = vst.msk [vmem:[#allocation3 + $0x21] sm:$0xff] %vm55_vm2, %v944_v8  ;;  %176 = vrot.lane.b32.xlu1 %v165_v9, %s942_s1  ;;  %v78_v10 = vld [vmem:[#allocation2 + $0x19] sm:$0xff] }
  0x35   :  { %174 = vrot.lane.b32.xlu0 %v158_v3, %s942_s1  ;;  %v76_v12 = vld [vmem:[#allocation2 + $0x1] sm:$0xff]  ;;  %p918_p1 = pnand %p917_p0, %p911_p11 }
  0x38   :  { %v79_v16 = vld [vmem:[#allocation2 + $0x21] sm:$0xff]  ;;  %v77_v17 = vld [vmem:[#allocation2 + $0x9] sm:$0xff] }
  0x3a   :  { %v135_v22 = vld [vmem:[#allocation3 + $0x9] sm:$0xff]  ;;  %v134_v23 = vld [vmem:[#allocation3 + $0x1] sm:$0xff] }
  0x3b   :  { %v137_v28 = vld [vmem:[#allocation3 + $0x21] sm:$0xff]  ;;  %v136_v29 = vld [vmem:[#allocation3 + $0x19] sm:$0xff] }
  0x99   :  { %v118_v11 = vpop.permute.xlu1 %117 }
  0x9a   :  { %v127_v13 = vadd.f32 %v118_v11, %v78_v10 }
  0x9b   :  { %v114_v14 = vpop.permute.xlu0 %113 }
  0x9c   :  { %132 = vst.msk [vmem:[#allocation2 + $0x19] sm:$0xff] %vm55_vm2, %v127_v13  ;;  %v125_v15 = vadd.f32 %v114_v14, %v76_v12 }
  0x9e   :  { %130 = vst.msk [vmem:[#allocation2 + $0x1] sm:$0xff] %vm55_vm2, %v125_v15  ;;  %v120_v18 = vpop.permute.xlu1 %119 }
  0x9f   :  { %v128_v19 = vadd.f32 %v120_v18, %v79_v16  ;;  %v116_v20 = vpop.permute.xlu0 %115 }
  0xa0   :  { %v126_v21 = vadd.f32 %v116_v20, %v77_v17 }
  0xa1   :  { %133 = vst.msk [vmem:[#allocation2 + $0x21] sm:$0xff] %vm55_vm2, %v128_v19 }
  0xa2   :  { %131 = vst.msk [vmem:[#allocation2 + $0x9] sm:$0xff] %vm55_vm2, %v126_v21  ;;  %v173_v24 = vpop.permute.xlu1 %172 }
  0xa3   :  { %v183_v25 = vmax.f32 %v135_v22, %v173_v24  ;;  %v171_v26 = vpop.permute.xlu0 %170  ;;  %v196_v39 = vld [vmem:[#allocation2 + $0x18] sm:$0xff] }
  0xa4   :  { %v182_v27 = vmax.f32 %v134_v23, %v171_v26  ;;  %v1109_v47 = vmul.f32 0.25, %v196_v39 }
  0xa5   :  { %187 = vst.msk [vmem:[#allocation3 + $0x9] sm:$0xff] %vm55_vm2, %v183_v25  ;;  %v193_v42 = vld [vmem:[#allocation2] sm:$0xff] }
  0xa6   :  { %186 = vst.msk [vmem:[#allocation3 + $0x1] sm:$0xff] %vm55_vm2, %v182_v27  ;;  %v177_v30 = vpop.permute.xlu1 %176  ;;  %v1117_v50 = vmul.f32 0.25, %v193_v42  ;;  %v365_v1 = vmul.f32 %v362_v46, %v1109_v47  ;;  %v1153_v2 = vmul.f32 %v1114_v48, %v1109_v47  ;;  %v1170_v10 = vmul.f32 %v1132_v59, %v1109_v47 }
  0xa7   :  { %v185_v31 = vmax.f32 %v137_v28, %v177_v30  ;;  %v175_v32 = vpop.permute.xlu0 %174 }
  0xa8   :  { %v184_v33 = vmax.f32 %v136_v29, %v175_v32  ;;  %v197_v54 = vld [vmem:[#allocation2 + $0x20] sm:$0xff]  ;;  %v363_v8 = vmul.f32 %v362_v46, %v1117_v50  ;;  %v198_v3 = vld [vmem:[#allocation2 + $0x28] sm:$0x3]  ;;  %v575_v15 = vmul.f32 %v1114_v48, %v1117_v50 }
  0xa9   :  { %189 = vst.msk [vmem:[#allocation3 + $0x21] sm:$0xff] %vm55_vm2, %v185_v31  ;;  %v194_v55 = vld [vmem:[#allocation2 + $0x8] sm:$0xff]  ;;  %v1161_v6 = vmul.f32 0.25, %v197_v54  ;;  %v1186_v22 = vmul.f32 0.25, %v198_v3 }
  0xaa   :  { %188 = vst.msk [vmem:[#allocation3 + $0x19] sm:$0xff] %vm55_vm2, %v184_v33  ;;  %v1163_v7 = vmul.f32 0.25, %v194_v55 }
  0xab   :  { %v366_v23 = vmul.f32 %v362_v46, %v1161_v6  ;;  %v1191_v24 = vmul.f32 %v1114_v48, %v1161_v6 }
  0xac   :  { %v1134_v60 = vld [vmem:[#allocation3 + $0x10] sm:$0x3]  ;;  %v364_v27 = vmul.f32 %v362_v46, %v1163_v7  ;;  %v576_v54 = vmul.f32 %v1114_v48, %v1163_v7 }
  0xad   :  { %v1078_v35 = vld [vmem:[#allocation3 + $0x8] sm:$0xff]  ;;  %v1080_v36 = vld [vmem:[#allocation3] sm:$0xff]  ;;  %v457_v13 = vmul.f32 %v454_v49, %v1134_v60  ;;  %v537_v14 = vmul.f32 %v534_v51, %v1134_v60  ;;  %v669_v26 = vmul.f32 %v1121_v52, %v1134_v60 }
  0xae   :  { %v390_v37 = vmul.f32 %v388_v34, %v1078_v35  ;;  %v389_v38 = vmul.f32 %v388_v34, %v1080_v36  ;;  %v602_v56 = vmul.f32 %v600_v45, %v1078_v35  ;;  %v601_v57 = vmul.f32 %v600_v45, %v1080_v36 }
  0xaf   :  { %v456_v16 = vmul.f32 %v454_v49, %v1078_v35  ;;  %v455_v17 = vmul.f32 %v454_v49, %v1080_v36  ;;  %v536_v18 = vmul.f32 %v534_v51, %v1078_v35  ;;  %v535_v21 = vmul.f32 %v534_v51, %v1080_v36 }
  0xb0   :  { %399 = vrot.lane.b32.xlu1 %v390_v37, %s945_s18  ;;  %397 = vrot.lane.b32.xlu0 %v389_v38, %s945_s18  ;;  %v1166_v9 = vld [vmem:[#allocation3 + $0x28] sm:$0x3]  ;;  %v668_v25 = vmul.f32 %v1121_v52, %v1078_v35  ;;  %v470_v28 = vrot.slane %v457_v13, 1  ;;  %v550_v30 = vrot.slane %v537_v14, 2  ;;  %v667_v46 = vmul.f32 %v1121_v52, %v1080_v36 }
  0xb1   :  { %v1102_v40 = vld [vmem:[#allocation3 + $0x20] sm:$0xff]  ;;  %v1104_v41 = vld [vmem:[#allocation3 + $0x18] sm:$0xff]  ;;  %v460_v20 = vmul.f32 %v454_v49, %v1166_v9  ;;  %v468_v31 = vrot.slane %v456_v16, 1  ;;  %v467_v32 = vrot.slane %v455_v17, 1  ;;  %v548_v39 = vrot.slane %v536_v18, 2 }
  0xb2   :  { %v392_v43 = vmul.f32 %v388_v34, %v1102_v40  ;;  %v391_v44 = vmul.f32 %v388_v34, %v1104_v41  ;;  %v604_v11 = vmul.f32 %v600_v45, %v1102_v40  ;;  %v603_v12 = vmul.f32 %v600_v45, %v1104_v41 }
  0xb3   :  { %v459_v19 = vmul.f32 %v454_v49, %v1102_v40  ;;  %v458_v29 = vmul.f32 %v454_v49, %v1104_v41  ;;  %v539_v33 = vmul.f32 %v534_v51, %v1102_v40  ;;  %v540_v34 = vmul.f32 %v534_v51, %v1166_v9  ;;  %v195_v49 = vld [vmem:[#allocation2 + $0x10] sm:$0x3] }
  0xb4   :  { %403 = vrot.lane.b32.xlu1 %v392_v43, %s945_s18  ;;  %401 = vrot.lane.b32.xlu0 %v391_v44, %s945_s18  ;;  %v475_v38 = vrot.slane %v460_v20, 1  ;;  %v547_v42 = vrot.slane %v535_v21, 2  ;;  %v538_v43 = vmul.f32 %v534_v51, %v1104_v41  ;;  %v680_v44 = vrot.slane %v668_v25, 1 }
  0xb5   :  { %v473_v37 = vrot.slane %v459_v19, 1  ;;  %v682_v45 = vrot.slane %v669_v26, 1  ;;  %v472_v55 = vrot.slane %v458_v29, 1  ;;  %v471_v51 = vsel %vm245_vm4, %v468_v31, %v470_v28 }
  0xb6   :  { %v553_v3 = vrot.slane %v539_v33, 2  ;;  %v1227_v13 = vsel %vm310_vm5, %v547_v42, %v548_v39  ;;  %v1229_v14 = vmul.f32 0.25, %v195_v49  ;;  %v552_v16 = vrot.slane %v538_v43, 2 }
  0xb7   :  { %v1221_v48 = vsel %vm245_vm4, %v473_v37, %v475_v38  ;;  %v1232_v17 = vsel %vm245_vm4, %v680_v44, %v682_v45  ;;  %v679_v18 = vrot.slane %v667_v46, 1  ;;  %v1236_v19 = vmul.f32 %v1132_v59, %v1163_v7 }
  0xb8   :  { %611 = vrot.lane.b32.xlu1 %v602_v56, %s946_s21  ;;  %609 = vrot.lane.b32.xlu0 %v601_v57, %s946_s21  ;;  %v1210_v56 = vmul.f32 %v1129_v58, %v1134_v60  ;;  %v1214_v57 = vmul.f32 %v1124_v53, %v1163_v7  ;;  %v1241_v20 = vmul.f32 %v1121_v52, %v1102_v40 }
  0xb9   :  { %v707_v21 = vmul.f32 %v1132_v59, %v1117_v50  ;;  %v1254_v26 = vmul.f32 %v1121_v52, %v1166_v9  ;;  %v1534_v28 = vrot.slane %v1236_v19, 2  ;;  %v1270_v33 = vsel %vm310_vm5, %v552_v16, %v553_v3 }
  0xba   :  { %v267_v45 = vmul.f32 %v1156_v4, %v1078_v35  ;;  %v268_v49 = vmul.f32 %v1156_v4, %v1134_v60 }
  0xbb   :  { %v719_v29 = vrot.slane %v707_v21, 2  ;;  %v687_v42 = vrot.slane %v1254_v26, 1  ;;  %v333_v21 = vmul.f32 %v1159_v5, %v1134_v60 }
  0xbc   :  { %615 = vrot.lane.b32.xlu1 %v604_v11, %s946_s21  ;;  %613 = vrot.lane.b32.xlu0 %v603_v12, %s946_s21  ;;  %v555_v11 = vrot.slane %v540_v34, 2  ;;  %v1224_v12 = vsel %vm310_vm5, %v548_v39, %v550_v30  ;;  %v1277_v34 = vmul.f32 %v1129_v58, %v1078_v35  ;;  %v281_v16 = vrot.slane %v268_v49, 1 }
  0xbd   :  { %v346_v60 = vrot.slane %v333_v21, 2  ;;  %v331_v49 = vmul.f32 %v1159_v5, %v1080_v36 }
  0xbe   :  { %v1250_v25 = vsel %vm310_vm5, %v553_v3, %v555_v11  ;;  %v279_v11 = vrot.slane %v267_v45, 1  ;;  %v266_v45 = vmul.f32 %v1156_v4, %v1080_v36 }
  0xbf   :  { %v343_v46 = vrot.slane %v331_v49, 2 }
  0xc0   :  { %373 = vrot.lane.b32.xlu1 %v364_v27, %s945_s18  ;;  %371 = vrot.lane.b32.xlu0 %v363_v8, %s945_s18  ;;  %v469_v8 = vsel %vm245_vm4, %v467_v32, %v468_v31  ;;  %v1258_v27 = vmul.f32 %v1121_v52, %v1104_v41  ;;  %v724_v31 = vrot.slane %v1170_v10, 2  ;;  %v1267_v32 = vmul.f32 %v1129_v58, %v1102_v40 }
  0xc1   :  { %v1273_v52 = vsel %vm245_vm4, %v679_v18, %v680_v44  ;;  %v1285_v10 = vsel %vm310_vm5, %v719_v29, %v1534_v28  ;;  %v235_v44 = vmul.f32 %v1143_v63, %v1229_v14 }
  0xc2   :  { %v1532_v39 = vrot.slane %v1267_v32, 2 }
  0xc4   :  { %377 = vrot.lane.b32.xlu1 %v366_v23, %s945_s18  ;;  %375 = vrot.lane.b32.xlu0 %v365_v1, %s945_s18  ;;  %v474_v1 = vsel %vm245_vm4, %v472_v55, %v473_v37  ;;  %v1247_v23 = vmul.f32 %v1132_v59, %v1161_v6  ;;  %v332_v55 = vmul.f32 %v1159_v5, %v1078_v35 }
  0xc6   :  { %v1533_v30 = vrot.slane %v1247_v23, 2  ;;  %v344_v29 = vrot.slane %v332_v55, 2 }
  0xc8   :  { %585 = vrot.lane.b32.xlu1 %v576_v54, %s946_s21  ;;  %583 = vrot.lane.b32.xlu0 %v575_v15, %s946_s21  ;;  %v750_v15 = vmul.f32 %v1129_v58, %v1104_v41  ;;  %v1290_v38 = vsel %vm310_vm5, %v724_v31, %v1533_v30  ;;  %v300_v54 = vmul.f32 %v1146_v0, %v1229_v14 }
  0xc9   :  { %v214_v31 = vmul.f32 %v1137_v61, %v1163_v7  ;;  %v213_v30 = vmul.f32 %v1137_v61, %v1117_v50  ;;  %v347_v28 = vsel %vm310_vm5, %v344_v29, %v346_v60 }
  0xca   :  { %v764_v43 = vrot.slane %v750_v15, 2  ;;  %v314_v18 = vrot.slane %v300_v54, 2  ;;  %v234_v15 = vmul.f32 %v1143_v63, %v1163_v7 }
  0xcc   :  { %589 = vrot.lane.b32.xlu1 %v1191_v24, %s946_s21  ;;  %587 = vrot.lane.b32.xlu0 %v1153_v2, %s946_s21  ;;  %v1312_v3 = vsel %vm310_vm5, %v764_v43, %v1532_v39  ;;  %v224_v24 = vmul.f32 %v1140_v62, %v1078_v35  ;;  %v249_v2 = vrot.slane %v235_v44, 1  ;;  %v299_v43 = vmul.f32 %v1146_v0, %v1163_v7 }
  0xcd   :  { %v223_v35 = vmul.f32 %v1140_v62, %v1080_v36  ;;  %v282_v44 = vsel %vm245_vm4, %v279_v11, %v281_v16  ;;  %v247_v55 = vrot.slane %v234_v15, 1 }
  0xce   :  { %v228_v54 = vadd.f32 %v224_v24, %v214_v31  ;;  %v312_v39 = vrot.slane %v299_v43, 2  ;;  %v298_v24 = vmul.f32 %v1146_v0, %v1117_v50  ;;  %v345_v43 = vsel %vm310_vm5, %v343_v46, %v344_v29 }
  0xcf   :  { %v250_v16 = vsel %vm245_vm4, %v247_v55, %v249_v2  ;;  %v227_v37 = vadd.f32 %v223_v35, %v213_v30  ;;  %v216_v2 = vmul.f32 %v1137_v61, %v1161_v6  ;;  %v226_v30 = vmul.f32 %v1140_v62, %v1102_v40 }
  0xd0   :  { %479 = vrot.lane.b32.xlu1 %v471_v51, %s945_s18  ;;  %477 = vrot.lane.b32.xlu0 %v469_v8, %s945_s18  ;;  %v278_v51 = vrot.slane %v266_v45, 1  ;;  %v233_v8 = vmul.f32 %v1143_v63, %v1117_v50  ;;  %v315_v21 = vsel %vm310_vm5, %v312_v39, %v314_v18  ;;  %v261_v31 = vadd.f32 %v250_v16, %v228_v54 }
  0xd1   :  { %v311_v45 = vrot.slane %v298_v24, 2  ;;  %v237_v18 = vmul.f32 %v1143_v63, %v1161_v6  ;;  %v270_v46 = vmul.f32 %v1156_v4, %v1102_v40  ;;  %v230_v49 = vadd.f32 %v226_v30, %v216_v2 }
  0xd2   :  { %v280_v15 = vsel %vm245_vm4, %v278_v51, %v279_v11  ;;  %v246_v60 = vrot.slane %v233_v8, 1  ;;  %v293_v35 = vadd.f32 %v282_v44, %v261_v31  ;;  %v335_v24 = vmul.f32 %v1159_v5, %v1102_v40 }
  0xd3   :  { %v313_v29 = vsel %vm310_vm5, %v311_v45, %v312_v39  ;;  %v252_v54 = vrot.slane %v237_v18, 1  ;;  %v284_v8 = vrot.slane %v270_v46, 1  ;;  %v303_v39 = vmul.f32 %v1146_v0, %v1186_v22 }
  0xd4   :  { %483 = vrot.lane.b32.xlu1 %v1221_v48, %s945_s18  ;;  %481 = vrot.lane.b32.xlu0 %v474_v1, %s945_s18  ;;  %v248_v48 = vsel %vm245_vm4, %v246_v60, %v247_v55  ;;  %v238_v1 = vmul.f32 %v1143_v63, %v1186_v22  ;;  %v326_v44 = vadd.f32 %v315_v21, %v293_v35 }
  0xd5   :  { %v260_v11 = vadd.f32 %v248_v48, %v227_v37  ;;  %v271_v55 = vmul.f32 %v1156_v4, %v1166_v9  ;;  %v302_v37 = vmul.f32 %v1146_v0, %v1161_v6  ;;  %v336_v31 = vmul.f32 %v1159_v5, %v1166_v9 }
  0xd6   :  { %v254_v51 = vrot.slane %v238_v1, 1  ;;  %v319_v2 = vrot.slane %v303_v39, 2  ;;  %v215_v18 = vmul.f32 %v1137_v61, %v1109_v47  ;;  %v225_v46 = vmul.f32 %v1140_v62, %v1104_v41 }
  0xd7   :  { %v292_v16 = vadd.f32 %v280_v15, %v260_v11  ;;  %v286_v21 = vrot.slane %v271_v55, 1  ;;  %v317_v15 = vrot.slane %v302_v37, 2  ;;  %v351_v30 = vrot.slane %v336_v31, 2 }
  0xd8   :  { %559 = vrot.lane.b32.xlu1 %v1224_v12, %s945_s18  ;;  %557 = vrot.lane.b32.xlu0 %v1227_v13, %s945_s18  ;;  %v1371_v12 = vadd.f32 %v347_v28, %v326_v44  ;;  %v255_v13 = vsel %vm245_vm4, %v252_v54, %v254_v51  ;;  %v349_v28 = vrot.slane %v335_v24, 2  ;;  %v269_v11 = vmul.f32 %v1156_v4, %v1104_v41 }
  0xd9   :  { %v325_v60 = vadd.f32 %v313_v29, %v292_v16  ;;  %v263_v45 = vadd.f32 %v255_v13, %v230_v49  ;;  %v287_v40 = vsel %vm245_vm4, %v284_v8, %v286_v21  ;;  %v320_v1 = vsel %vm310_vm5, %v317_v15, %v319_v2 }
  0xda   :  { %v301_v29 = vmul.f32 %v1146_v0, %v1109_v47  ;;  %v747_v61 = vmul.f32 %v1129_v58, %v1080_v36  ;;  %v229_v49 = vadd.f32 %v225_v46, %v215_v18  ;;  %v334_v44 = vmul.f32 %v1159_v5, %v1104_v41 }
  0xdb   :  { %v1383_v35 = vadd.f32 %v345_v43, %v325_v60  ;;  %v295_v48 = vadd.f32 %v287_v40, %v263_v45  ;;  %v417_v62 = vmul.f32 %v1124_v53, %v1229_v14  ;;  %v283_v4 = vrot.slane %v269_v11, 1 }
  0xdc   :  { %563 = vrot.lane.b32.xlu1 %v1250_v25, %s945_s18  ;;  %561 = vrot.lane.b32.xlu0 %v1270_v33, %s945_s18  ;;  %v352_v25 = vsel %vm310_vm5, %v349_v28, %v351_v30  ;;  %v236_v33 = vmul.f32 %v1143_v63, %v1109_v47  ;;  %v316_v0 = vrot.slane %v301_v29, 2  ;;  %v760_v51 = vrot.slane %v1277_v34, 2 }
  0xdd   :  { %v328_v43 = vadd.f32 %v320_v1, %v295_v48  ;;  %v762_v36 = vrot.slane %v1210_v56, 2  ;;  %v348_v16 = vrot.slane %v334_v44, 2  ;;  %v1535_v41 = vrot.slane %v1241_v20, 1 }
  0xde   :  { %v251_v63 = vrot.slane %v236_v33, 1  ;;  %v318_v37 = vsel %vm310_vm5, %v316_v0, %v317_v15  ;;  %v1537_v56 = vrot.slane %v1258_v27, 1  ;;  %v759_v24 = vrot.slane %v747_v61, 2 }
  0xdf   :  { %v1407_v55 = vadd.f32 %v352_v25, %v328_v43  ;;  %v688_v5 = vsel %vm245_vm4, %v1535_v41, %v687_v42  ;;  %v1536_v34 = vmov %v1535_v41  ;;  %v350_v26 = vsel %vm310_vm5, %v348_v16, %v349_v28 }
  0xe0   :  { %691 = vrot.lane.b32.xlu1 %v1232_v17, %s946_s21  ;;  %689 = vrot.lane.b32.xlu0 %v1273_v52, %s946_s21  ;;  %v253_v17 = vsel %vm245_vm4, %v251_v63, %v252_v54  ;;  %v285_v52 = vsel %vm245_vm4, %v283_v4, %v284_v8  ;;  %v686_v39 = vsel %vm245_vm4, %v1537_v56, %v1536_v34  ;;  %v428_v8 = vrot.slane %v1214_v57, 1 }
  0xe1   :  { %v262_v13 = vadd.f32 %v253_v17, %v229_v49  ;;  %v415_v42 = vmul.f32 %v1124_v53, %v1117_v50  ;;  %v419_v20 = vmul.f32 %v1124_v53, %v1161_v6  ;;  %v420_v27 = vmul.f32 %v1124_v53, %v1186_v22 }
  0xe2   :  { %v763_v21 = vsel %vm310_vm5, %v760_v51, %v762_v36  ;;  %v761_v31 = vsel %vm310_vm5, %v759_v24, %v760_v51  ;;  %v430_v60 = vrot.slane %v417_v62, 1  ;;  %v418_v15 = vmul.f32 %v1124_v53, %v1109_v47 }
  0xe3   :  { %v294_v54 = vadd.f32 %v285_v52, %v262_v13  ;;  %v427_v57 = vrot.slane %v415_v42, 1  ;;  %v433_v40 = vrot.slane %v419_v20, 1  ;;  %v435_v28 = vrot.slane %v420_v27, 1 }
  0xe4   :  { %695 = vrot.lane.b32.xlu1 %v688_v5, %s946_s21  ;;  %693 = vrot.lane.b32.xlu0 %v686_v39, %s946_s21  ;;  %v494_v30 = vstv %s840_s22  ;;  %v431_v18 = vsel %vm245_vm4, %v428_v8, %v430_v60  ;;  %v432_v53 = vrot.slane %v418_v15, 1  ;;  %v626_v63 = vstv %s844_s23 }
  0xe5   :  { %v327_v45 = vadd.f32 %v318_v37, %v294_v54  ;;  %v429_v48 = vsel %vm245_vm4, %v427_v57, %v428_v8  ;;  %v496_v1 = vmul.f32 %v494_v30, %v1163_v7  ;;  %v497_v46 = vmul.f32 %v494_v30, %v1229_v14 }
  0xe6   :  { %v495_v25 = vmul.f32 %v494_v30, %v1117_v50  ;;  %v436_v33 = vsel %vm245_vm4, %v433_v40, %v435_v28  ;;  %v434_v11 = vsel %vm245_vm4, %v432_v53, %v433_v40  ;;  %v499_v43 = vmul.f32 %v494_v30, %v1161_v6 }
  0xe7   :  { %v1438_v2 = vadd.f32 %v350_v26, %v327_v45  ;;  %v508_v29 = vrot.slane %v496_v1, 2  ;;  %v510_v61 = vrot.slane %v497_v46, 2  ;;  %v500_v49 = vmul.f32 %v494_v30, %v1186_v22 }
  0xe8   :  { %771 = vrot.lane.b32.xlu1 %v763_v21, %s946_s21  ;;  %769 = vrot.lane.b32.xlu0 %v761_v31, %s946_s21  ;;  %v507_v44 = vrot.slane %v495_v25, 2  ;;  %v498_v62 = vmul.f32 %v494_v30, %v1109_v47  ;;  %v628_v4 = vmul.f32 %v626_v63, %v1163_v7  ;;  %v629_v0 = vmul.f32 %v626_v63, %v1229_v14 }
  0xe9   :  { %v511_v51 = vsel %vm310_vm5, %v508_v29, %v510_v61  ;;  %v513_v16 = vrot.slane %v499_v43, 2  ;;  %v515_v41 = vrot.slane %v500_v49, 2  ;;  %v627_v17 = vmul.f32 %v626_v63, %v1117_v50 }
  0xea   :  { %v509_v36 = vsel %vm310_vm5, %v507_v44, %v508_v29  ;;  %v512_v5 = vrot.slane %v498_v62, 2  ;;  %v640_v52 = vrot.slane %v628_v4, 1  ;;  %v642_v37 = vrot.slane %v629_v0, 1 }
  0xeb   :  { %v516_v34 = vsel %vm310_vm5, %v513_v16, %v515_v41  ;;  %v631_v56 = vmul.f32 %v626_v63, %v1161_v6  ;;  %v632_v39 = vmul.f32 %v626_v63, %v1186_v22  ;;  %v639_v24 = vrot.slane %v627_v17, 1 }
  0xec   :  { %439 = vrot.lane.b32.xlu1 %v431_v18, %s945_s18  ;;  %437 = vrot.lane.b32.xlu0 %v429_v48, %s945_s18  ;;  %v514_v7 = vsel %vm310_vm5, %v512_v5, %v513_v16  ;;  %v630_v13 = vmul.f32 %v626_v63, %v1109_v47  ;;  %v643_v26 = vsel %vm245_vm4, %v640_v52, %v642_v37  ;;  %v1538_v31 = vrot.slane %v1236_v19, 2 }
  0xed   :  { %v641_v50 = vsel %vm245_vm4, %v639_v24, %v640_v52  ;;  %v645_v42 = vrot.slane %v631_v56, 1  ;;  %v647_v54 = vrot.slane %v632_v39, 1  ;;  %v709_v8 = vmul.f32 %v1132_v59, %v1229_v14 }
  0xee   :  { %v644_v6 = vrot.slane %v630_v13, 1  ;;  %v712_v47 = vmul.f32 %v1132_v59, %v1186_v22  ;;  %v752_v45 = vmul.f32 %v1129_v58, %v1166_v9  ;;  %v1539_v15 = vrot.slane %v1247_v23, 2 }
  0xef   :  { %v648_v20 = vsel %vm245_vm4, %v645_v42, %v647_v54  ;;  %v722_v21 = vrot.slane %v709_v8, 2  ;;  %v1540_v19 = vrot.slane %v1267_v32, 2 }
  0xf0   :  { %443 = vrot.lane.b32.xlu1 %v436_v33, %s945_s18  ;;  %441 = vrot.lane.b32.xlu0 %v434_v11, %s945_s18  ;;  %v646_v27 = vsel %vm245_vm4, %v644_v6, %v645_v42  ;;  %v727_v60 = vrot.slane %v712_v47, 2  ;;  %v767_v22 = vrot.slane %v752_v45, 2 }
  0xf1   :  { %v723_v14 = vsel %vm310_vm5, %v1538_v31, %v722_v21 }
  0xf2   :  { %v728_v59 = vsel %vm310_vm5, %v1539_v15, %v727_v60  ;;  %v768_v57 = vsel %vm310_vm5, %v1540_v19, %v767_v22 }
  0xf4   :  { %519 = vrot.lane.b32.xlu1 %v511_v51, %s945_s18  ;;  %517 = vrot.lane.b32.xlu0 %v509_v36, %s945_s18 }
  0xf8   :  { %523 = vrot.lane.b32.xlu1 %v516_v34, %s945_s18  ;;  %521 = vrot.lane.b32.xlu0 %v514_v7, %s945_s18 }
  0xfc   :  { %651 = vrot.lane.b32.xlu1 %v643_v26, %s946_s21  ;;  %649 = vrot.lane.b32.xlu0 %v641_v50, %s946_s21 }
 0x100   :  { %655 = vrot.lane.b32.xlu1 %v648_v20, %s946_s21  ;;  %653 = vrot.lane.b32.xlu0 %v646_v27, %s946_s21 }
 0x104   :  { %731 = vrot.lane.b32.xlu1 %v723_v14, %s946_s21  ;;  %729 = vrot.lane.b32.xlu0 %v1285_v10, %s946_s21 }
 0x108   :  { %735 = vrot.lane.b32.xlu1 %v728_v59, %s946_s21  ;;  %733 = vrot.lane.b32.xlu0 %v1290_v38, %s946_s21 }
 0x10c   :  { %775 = vrot.lane.b32.xlu1 %v768_v57, %s946_s21  ;;  %773 = vrot.lane.b32.xlu0 %v1312_v3, %s946_s21 }
 0x122   :  { %v400_v58 = vpop.permute.xlu1 %399  ;;  %v398_v9 = vpop.permute.xlu0 %397 }
 0x126   :  { %v404_v23 = vpop.permute.xlu1 %403  ;;  %v402_v10 = vpop.permute.xlu0 %401 }
 0x12a   :  { %v612_v40 = vpop.permute.xlu1 %611  ;;  %v610_v28 = vpop.permute.xlu0 %609 }
 0x12e   :  { %v1500_v30 = vpop.permute.xlu1 %615  ;;  %v1502_v18 = vpop.permute.xlu0 %613 }
 0x132   :  { %v374_v38 = vpop.permute.xlu1 %373  ;;  %v372_v48 = vpop.permute.xlu0 %371 }
 0x133   :  { %v384_v32 = vadd.f32 %v374_v38, %v1371_v12  ;;  %v383_v1 = vadd.f32 %v372_v48, %v1383_v35 }
 0x135   :  { %v410_v46 = vadd.f32 %v400_v58, %v384_v32  ;;  %v409_v53 = vadd.f32 %v398_v9, %v383_v1 }
 0x136   :  { %v378_v25 = vpop.permute.xlu1 %377  ;;  %v376_v3 = vpop.permute.xlu0 %375 }
 0x137   :  { %v386_v33 = vadd.f32 %v378_v25, %v1407_v55  ;;  %v385_v11 = vadd.f32 %v376_v3, %v1438_v2 }
 0x139   :  { %v412_v29 = vadd.f32 %v404_v23, %v386_v33  ;;  %v411_v61 = vadd.f32 %v402_v10, %v385_v11 }
 0x13a   :  { %v586_v43 = vpop.permute.xlu1 %585  ;;  %v584_v49 = vpop.permute.xlu0 %583 }
 0x13e   :  { %v590_v44 = vpop.permute.xlu1 %589  ;;  %v588_v62 = vpop.permute.xlu0 %587 }
 0x142   :  { %v480_v63 = vpop.permute.xlu1 %479  ;;  %v478_v4 = vpop.permute.xlu0 %477 }
 0x146   :  { %v484_v0 = vpop.permute.xlu1 %483  ;;  %v482_v12 = vpop.permute.xlu0 %481 }
 0x14a   :  { %v560_v51 = vpop.permute.xlu1 %559  ;;  %v558_v35 = vpop.permute.xlu0 %557 }
 0x14e   :  { %v564_v36 = vpop.permute.xlu1 %563  ;;  %v562_v16 = vpop.permute.xlu0 %561 }
 0x152   :  { %v692_v41 = vpop.permute.xlu1 %691  ;;  %v690_v5 = vpop.permute.xlu0 %689 }
 0x156   :  { %v696_v17 = vpop.permute.xlu1 %695  ;;  %v694_v55 = vpop.permute.xlu0 %693 }
 0x15a   :  { %v772_v52 = vpop.permute.xlu1 %771  ;;  %v770_v2 = vpop.permute.xlu0 %769 }
 0x15e   :  { %v440_v37 = vpop.permute.xlu1 %439  ;;  %v438_v34 = vpop.permute.xlu0 %437 }
 0x15f   :  { %v450_v7 = vadd.f32 %v440_v37, %v410_v46  ;;  %v449_v56 = vadd.f32 %v438_v34, %v409_v53 }
 0x161   :  { %v490_v50 = vadd.f32 %v480_v63, %v450_v7  ;;  %v489_v42 = vadd.f32 %v478_v4, %v449_v56 }
 0x162   :  { %v444_v39 = vpop.permute.xlu1 %443  ;;  %v442_v24 = vpop.permute.xlu0 %441 }
 0x163   :  { %v452_v13 = vadd.f32 %v444_v39, %v412_v29  ;;  %v451_v26 = vadd.f32 %v442_v24, %v411_v61 }
 0x165   :  { %v492_v47 = vadd.f32 %v484_v0, %v452_v13  ;;  %v491_v31 = vadd.f32 %v482_v12, %v451_v26 }
 0x166   :  { %v520_v54 = vpop.permute.xlu1 %519  ;;  %v518_v8 = vpop.permute.xlu0 %517 }
 0x167   :  { %v530_v6 = vadd.f32 %v520_v54, %v490_v50  ;;  %v529_v20 = vadd.f32 %v518_v8, %v489_v42 }
 0x169   :  { %v570_v27 = vadd.f32 %v560_v51, %v530_v6  ;;  %v569_v21 = vadd.f32 %v558_v35, %v529_v20 }
 0x16a   :  { %v524_v14 = vpop.permute.xlu1 %523  ;;  %v522_v60 = vpop.permute.xlu0 %521 }
 0x16b   :  { %v532_v45 = vadd.f32 %v524_v14, %v492_v47  ;;  %v531_v15 = vadd.f32 %v522_v60, %v491_v31  ;;  %v596_v59 = vadd.f32 %v586_v43, %v570_v27  ;;  %v595_v22 = vadd.f32 %v584_v49, %v569_v21 }
 0x16d   :  { %v572_v19 = vadd.f32 %v564_v36, %v532_v45  ;;  %v571_v57 = vadd.f32 %v562_v16, %v531_v15  ;;  %v622_v58 = vadd.f32 %v612_v40, %v596_v59  ;;  %v621_v9 = vadd.f32 %v610_v28, %v595_v22 }
 0x16e   :  { %v652_v23 = vpop.permute.xlu1 %651  ;;  %v650_v10 = vpop.permute.xlu0 %649 }
 0x16f   :  { %v598_v38 = vadd.f32 %v590_v44, %v572_v19  ;;  %v597_v48 = vadd.f32 %v588_v62, %v571_v57  ;;  %v662_v32 = vadd.f32 %v652_v23, %v622_v58  ;;  %v661_v1 = vadd.f32 %v650_v10, %v621_v9 }
 0x171   :  { %v624_v46 = vadd.f32 %v1500_v30, %v598_v38  ;;  %v623_v53 = vadd.f32 %v1502_v18, %v597_v48  ;;  %v702_v33 = vadd.f32 %v692_v41, %v662_v32  ;;  %v701_v11 = vadd.f32 %v690_v5, %v661_v1 }
 0x172   :  { %v656_v25 = vpop.permute.xlu1 %655  ;;  %v654_v3 = vpop.permute.xlu0 %653 }
 0x173   :  { %v664_v43 = vadd.f32 %v656_v25, %v624_v46  ;;  %v663_v49 = vadd.f32 %v654_v3, %v623_v53 }
 0x175   :  { %v704_v51 = vadd.f32 %v696_v17, %v664_v43  ;;  %v703_v30 = vadd.f32 %v694_v55, %v663_v49 }
 0x176   :  { %v732_v29 = vpop.permute.xlu1 %731  ;;  %v730_v61 = vpop.permute.xlu0 %729 }
 0x177   :  { %v742_v40 = vadd.f32 %v732_v29, %v702_v33  ;;  %v741_v28 = vadd.f32 %v730_v61, %v701_v11 }
 0x179   :  { %v782_v63 = vadd.f32 %v772_v52, %v742_v40  ;;  %v781_v4 = vadd.f32 %v770_v2, %v741_v28 }
 0x17a   :  { %v736_v44 = vpop.permute.xlu1 %735  ;;  %v734_v62 = vpop.permute.xlu0 %733 }
 0x17b   :  { %v849_v0 = vmul.f32 -1.442695, %v782_v63  ;;  %v848_v12 = vmul.f32 -1.442695, %v781_v4  ;;  %v744_v18 = vadd.f32 %v736_v44, %v704_v51  ;;  %v743_v35 = vadd.f32 %v734_v62, %v703_v30 }
 0x17d   :  { %862 = vpow2.f32 %v849_v0 }
 0x17e   :  { %864 = vpow2.f32 %v848_v12  ;;  %v776_v36 = vpop.permute.xlu1 %775  ;;  %v774_v16 = vpop.permute.xlu0 %773 }
 0x17f   :  { %v784_v41 = vadd.f32 %v776_v36, %v744_v18  ;;  %v783_v5 = vadd.f32 %v774_v16, %v743_v35 }
 0x181   :  { %v851_v37 = vmul.f32 -1.442695, %v784_v41  ;;  %v850_v34 = vmul.f32 -1.442695, %v783_v5 }
 0x183   :  { %866 = vpow2.f32 %v851_v37 }
 0x184   :  { %868 = vpow2.f32 %v850_v34 }
 0x187   :  { %v863_v52 = vpop.eup %862 }
 0x188   :  { %v865_v2 = vpop.eup %864  ;;  %v798_v7 = vadd.f32 1.0, %v863_v52 }
 0x189   :  { %v797_v56 = vadd.f32 1.0, %v865_v2 }
 0x18a   :  { %870 = vrcp.f32 %v798_v7 }
 0x18b   :  { %872 = vrcp.f32 %v797_v56 }
 0x18d   :  { %v867_v17 = vpop.eup %866 }
 0x18e   :  { %v869_v55 = vpop.eup %868  ;;  %v800_v39 = vadd.f32 1.0, %v867_v17 }
 0x18f   :  { %v799_v24 = vadd.f32 1.0, %v869_v55 }
 0x190   :  { %874 = vrcp.f32 %v800_v39 }
 0x191   :  { %876 = vrcp.f32 %v799_v24 }
 0x194   :  { %v871_v13 = vpop.eup %870 }
 0x195   :  { %v873_v26 = vpop.eup %872  ;;  %810 = vst.msk [vmem:[#allocation9 + $0x8] sm:$0xff] %vm80_vm0, %v871_v13 }
 0x196   :  { %809 = vst.msk [vmem:[#allocation9] sm:$0xff] %vm80_vm0, %v873_v26 }
 0x19a   :  { %v875_v50 = vpop.eup %874 }
 0x19b   :  { %v877_v42 = vpop.eup %876  ;;  %812 = vst.msk [vmem:[#allocation9 + $0x18] sm:$0xff] %vm80_vm0, %v875_v50 }
 0x19c   :  { %811 = vst.msk [vmem:[#allocation9 + $0x10] sm:$0xff] %vm80_vm0, %v877_v42 }
 0x19d   :  { %921 = shalt.err (!%p918_p1)
}
 0x19e   :  { %s922_s30 = scalar_lea.hbm %s1531_s2, 512 }
 0x19f   :  { %p923_p2 = scmp.ne.s32.totalorder %s1531_s2, %s922_s30  ;;  %p926_p3 = scmp.lt.u32.totalorder %s922_s30, %s1531_s2 }
 0x1a1   :  { %p928_p4 = pnand %p926_p3, %p923_p2 }
 0x1a3   :  { %931 = shalt.err (!%p928_p4)
}
 0x1a4   :  { %824 = dma.vmem_to_hbm [thread:$0]  %s819_s25, 512, %s1531_s2, [#allocation6], %s940_s0, %s940_s0, %s941_s29  }
 0x1a5   :  { %936 = dma.done.wait [#allocation6], 512  }
 0x1a6   :  { %937 = vsyncadd [#allocation6], 4294966784 }
 0x1a7   :  { %828 = vsyncpa [#allocation5], 1 }
 0x1a8   :  { %829 = vsyncpa [#allocation6], 1 }
 0x1a9   :  { %830 = vsyncpa [#allocation7], 1 }

</bundles_post_ra>
